<compile_context>
chip_gen: v7x
topology: tpu7x:2x2x1
jax: 0.10.0
libtpu: 0.0.40
codegen_flags: <defaults>
</compile_context>

<pallas_src>
import functools

import jax
import jax.numpy as jnp
from jax.experimental import pallas as pl
from jax.experimental.pallas import tpu as pltpu

_EPS = 1e-8


def _round_up(a, m):
    return ((a + m - 1) // m) * m


def _cdiv(a, b):
    return -(-a // b)


def _cos_sqerr_kernel(x1_ref, x2_ref, lbl_ref, out_ref, *, eps, feat, fold):
    """One grid step: a [TB, fold*feat] tile of folded rows -> [TB, fold] sq. errors.

    Each kernel row packs `fold` original rows (lane-dense layout when the
    original feature dim `feat` < 128). Per-original-row reductions are exact
    f32 segmented lane reductions (XLU), so no MXU precision concerns.
    """
    x1 = x1_ref[...].astype(jnp.float32)
    x2 = x2_ref[...].astype(jnp.float32)
    lbl = lbl_ref[...]  # [TB, fold] float32

    def segsum(v):
        parts = [
            jnp.sum(v[:, c * feat:(c + 1) * feat], axis=1, keepdims=True)
            for c in range(fold)
        ]
        return parts[0] if fold == 1 else jnp.concatenate(parts, axis=1)

    dot = segsum(x1 * x2)   # [TB, fold]
    s1 = segsum(x1 * x1)
    s2 = segsum(x2 * x2)

    # torch.nn.functional.cosine_similarity clamps the *product* of the norms:
    #   cos = dot / max(||x1|| * ||x2||, eps) == dot * rsqrt(max(s1*s2, eps^2))
    # rsqrt goes to the EUP slot (free in this HBM-bound kernel).
    denom_sq = jnp.maximum(s1 * s2, jnp.float32(eps) * jnp.float32(eps))
    cos = dot * jax.lax.rsqrt(denom_sq)

    diff = cos - lbl
    out_ref[...] = diff * diff


def cosine_similarity_loss(x1, x2, labels, *, eps=_EPS,
                           target_block_bytes=2 * 1024 * 1024,
                           min_grid_steps=8):
    """MSE(cosine_similarity(x1, x2, dim=1, eps), labels.view(-1))."""
    assert x1.shape == x2.shape and x1.ndim == 2, (x1.shape, x2.shape)
    B, D = x1.shape
    labels_f = jnp.asarray(labels).reshape(-1).astype(jnp.float32)
    assert labels_f.shape[0] == B

    itemsize = jnp.dtype(x1.dtype).itemsize
    row_mult = {4: 8, 2: 16, 1: 32}.get(itemsize, 8)  # sublane-packing multiple

    # Lane-dense folding: pack k = 128 // D original rows into one 128-lane row.
    k = 128 // D if (D < 128 and 128 % D == 0) else 1
    Df = k * D

    # Tile sizing: ~target_block_bytes per input tile, but small enough that a
    # large batch still gets >= min_grid_steps pipelined grid steps.
    rows_needed = _cdiv(B, k)
    row_bytes = Df * itemsize
    by_bytes = max(row_mult,
                   (target_block_bytes // row_bytes) // row_mult * row_mult)
    by_steps = max(row_mult,
                   _round_up(_cdiv(rows_needed, min_grid_steps), row_mult))
    block_rows = max(row_mult, min(by_bytes, by_steps))

    rows_pad = _round_up(rows_needed, block_rows)
    B_pad = rows_pad * k
    grid = rows_pad // block_rows

    # Zero-pad the batch: padded rows give cos == 0 and label == 0, so they
    # contribute nothing to the sum; the mean divides by the true B below.
    if B_pad != B:
        pad = B_pad - B
        x1 = jnp.concatenate([x1, jnp.zeros((pad, D), x1.dtype)], axis=0)
        x2 = jnp.concatenate([x2, jnp.zeros((pad, D), x2.dtype)], axis=0)
        labels_f = jnp.concatenate(
            [labels_f, jnp.zeros((pad,), jnp.float32)], axis=0)

    # Free row-major reshapes (no data movement); every DMA row / vreg lane is
    # dense when D < 128.
    x1f = x1.reshape(rows_pad, Df)
    x2f = x2.reshape(rows_pad, Df)
    lblf = labels_f.reshape(rows_pad, k)

    kernel = functools.partial(_cos_sqerr_kernel, eps=eps, feat=D, fold=k)
    x_spec = pl.BlockSpec((block_rows, Df), lambda i: (i, 0))
    # TODO(synk): if a profile shows exposed DMA at this tile size, bump the x
    # input specs to pipeline_mode=pl.Buffered(3) (watch VMEM on v7x).

    sqerr = pl.pallas_call(
        kernel,
        out_shape=jax.ShapeDtypeStruct((rows_pad, k), jnp.float32),
        grid_spec=pltpu.PrefetchScalarGridSpec(
            num_scalar_prefetch=0,
            grid=(grid,),
            in_specs=[
                x_spec,
                x_spec,
                pl.BlockSpec((block_rows, k), lambda i: (i, 0)),
            ],
            out_specs=pl.BlockSpec((block_rows, k), lambda i: (i, 0)),
        ),
        compiler_params=pltpu.CompilerParams(
            # Independent per-block outputs => grid axis is parallel
            # (megacore-shardable on v7x); no in-kernel accumulator.
            dimension_semantics=("parallel",),
            # Explicit scoped-VMEM budget: 2 inputs x 2 pipeline buffers x
            # ~2 MiB tiles (+ f32 temporaries) fits comfortably under 32 MiB on
            # every generation (raises v5e's 16 MiB default).
            vmem_limit_bytes=32 * 1024 * 1024,
        ),
    )(x1f, x2f, lblf)

    # Final reduction + MSE mean in plain JAX (keeps the kernel streaming).
    return jnp.sum(sqerr) / jnp.float32(B)


def _reference(x1, x2, labels, eps=_EPS):
    x1 = x1.astype(jnp.float32)
    x2 = x2.astype(jnp.float32)
    dot = jnp.sum(x1 * x2, axis=1)
    s1 = jnp.sum(x1 * x1, axis=1)
    s2 = jnp.sum(x2 * x2, axis=1)
    cos = dot / jnp.maximum(jnp.sqrt(s1 * s2), eps)
    lbl = labels.reshape(-1).astype(jnp.float32)
    return jnp.mean((cos - lbl) ** 2)


if __name__ == "__main__":
    # 1) Module-scale example: batch=8, hidden=32 (lane-dense fold path).
    k1, k2, k3 = jax.random.split(jax.random.PRNGKey(0), 3)
    x1 = jax.random.normal(k1, (8, 32), dtype=jnp.float32)
    x2 = jax.random.normal(k2, (8, 32), dtype=jnp.float32)
    lbl = jax.random.uniform(k3, (8,), dtype=jnp.float32, minval=-1.0, maxval=1.0)
    out = cosine_similarity_loss(x1, x2, lbl)
    jax.block_until_ready(out)
    ref = _reference(x1, x2, lbl)
    assert jnp.allclose(out, ref, rtol=1e-5, atol=1e-6), (out, ref)

    # 2) D >= 128 path with a multi-step pipelined grid (B=512, D=256 -> 8 steps).
    k4, k5, k6 = jax.random.split(jax.random.PRNGKey(1), 3)
    x1b = jax.random.normal(k4, (512, 256), dtype=jnp.float32)
    x2b = jax.random.normal(k5, (512, 256), dtype=jnp.float32)
    lblb = jax.random.uniform(k6, (512,), dtype=jnp.float32, minval=-1.0, maxval=1.0)
    outb = cosine_similarity_loss(x1b, x2b, lblb)
    jax.block_until_ready(outb)
    refb = _reference(x1b, x2b, lblb)
    assert jnp.allclose(outb, refb, rtol=1e-5, atol=1e-6), (outb, refb)

    # 3) bf16 inputs (halved HBM traffic), ragged batch needing padding.
    k7, k8, k9 = jax.random.split(jax.random.PRNGKey(2), 3)
    x1c = jax.random.normal(k7, (300, 32), dtype=jnp.bfloat16)
    x2c = jax.random.normal(k8, (300, 32), dtype=jnp.bfloat16)
    lblc = jax.random.uniform(k9, (300,), dtype=jnp.float32, minval=-1.0, maxval=1.0)
    outc = cosine_similarity_loss(x1c, x2c, lblc)
    jax.block_until_ready(outc)
    refc = _reference(x1c, x2c, lblc)
    assert jnp.allclose(outc, refc, rtol=1e-4, atol=1e-5), (outc, refc)

    print("KERNEL_OK")
</pallas_src>

<mosaic_0001>
module attributes {stable_mosaic.version = 11 : i64} {
  func.func @_cos_sqerr_kernel(%arg0: i32, %arg1: memref<8x128xf32, #tpu.memory_space<vmem>>, %arg2: memref<8x128xf32, #tpu.memory_space<vmem>>, %arg3: memref<8x4xf32, #tpu.memory_space<vmem>>, %arg4: memref<8x4xf32, #tpu.memory_space<vmem>>) attributes {dimension_semantics = [#tpu.dimension_semantics<parallel>], iteration_bounds = array<i64: 1>, scalar_prefetch = 0 : i64, scratch_operands = 0 : i64, tpu.core_type = #tpu.core_type<tc>, window_params = [{transform_indices = @transform_0, window_bounds = array<i64: 8, 128>}, {transform_indices = @transform_1, window_bounds = array<i64: 8, 128>}, {transform_indices = @transform_2, window_bounds = array<i64: 8, 4>}, {transform_indices = @transform_3, window_bounds = array<i64: 8, 4>}]} {
    %c0 = arith.constant 0 : index
    %c0_0 = arith.constant 0 : index
    %0 = vector.load %arg1[%c0, %c0_0] : memref<8x128xf32, #tpu.memory_space<vmem>>, vector<8x128xf32>
    %c0_1 = arith.constant 0 : index
    %c0_2 = arith.constant 0 : index
    %1 = vector.load %arg2[%c0_1, %c0_2] : memref<8x128xf32, #tpu.memory_space<vmem>>, vector<8x128xf32>
    %c0_3 = arith.constant 0 : index
    %c0_4 = arith.constant 0 : index
    %2 = vector.load %arg3[%c0_3, %c0_4] : memref<8x4xf32, #tpu.memory_space<vmem>>, vector<8x4xf32>
    %3 = arith.mulf %0, %1 : vector<8x128xf32>
    %4 = vector.extract_strided_slice %3 {offsets = [0, 0], sizes = [8, 32], strides = [1, 1]} : vector<8x128xf32> to vector<8x32xf32>
    %cst = arith.constant dense<0.000000e+00> : vector<8xf32>
    %5 = vector.multi_reduction <add>, %4, %cst [1] : vector<8x32xf32> to vector<8xf32>
    %6 = vector.shape_cast %5 : vector<8xf32> to vector<8x1xf32>
    %7 = vector.extract_strided_slice %3 {offsets = [0, 32], sizes = [8, 32], strides = [1, 1]} : vector<8x128xf32> to vector<8x32xf32>
    %cst_5 = arith.constant dense<0.000000e+00> : vector<8xf32>
    %8 = vector.multi_reduction <add>, %7, %cst_5 [1] : vector<8x32xf32> to vector<8xf32>
    %9 = vector.shape_cast %8 : vector<8xf32> to vector<8x1xf32>
    %10 = vector.extract_strided_slice %3 {offsets = [0, 64], sizes = [8, 32], strides = [1, 1]} : vector<8x128xf32> to vector<8x32xf32>
    %cst_6 = arith.constant dense<0.000000e+00> : vector<8xf32>
    %11 = vector.multi_reduction <add>, %10, %cst_6 [1] : vector<8x32xf32> to vector<8xf32>
    %12 = vector.shape_cast %11 : vector<8xf32> to vector<8x1xf32>
    %13 = vector.extract_strided_slice %3 {offsets = [0, 96], sizes = [8, 32], strides = [1, 1]} : vector<8x128xf32> to vector<8x32xf32>
    %cst_7 = arith.constant dense<0.000000e+00> : vector<8xf32>
    %14 = vector.multi_reduction <add>, %13, %cst_7 [1] : vector<8x32xf32> to vector<8xf32>
    %15 = vector.shape_cast %14 : vector<8xf32> to vector<8x1xf32>
    %16 = tpu.concatenate %6, %9, %12, %15 in 1 : vector<8x1xf32>, vector<8x1xf32>, vector<8x1xf32>, vector<8x1xf32> -> vector<8x4xf32>
    %17 = arith.mulf %0, %0 : vector<8x128xf32>
    %18 = vector.extract_strided_slice %17 {offsets = [0, 0], sizes = [8, 32], strides = [1, 1]} : vector<8x128xf32> to vector<8x32xf32>
    %cst_8 = arith.constant dense<0.000000e+00> : vector<8xf32>
    %19 = vector.multi_reduction <add>, %18, %cst_8 [1] : vector<8x32xf32> to vector<8xf32>
    %20 = vector.shape_cast %19 : vector<8xf32> to vector<8x1xf32>
    %21 = vector.extract_strided_slice %17 {offsets = [0, 32], sizes = [8, 32], strides = [1, 1]} : vector<8x128xf32> to vector<8x32xf32>
    %cst_9 = arith.constant dense<0.000000e+00> : vector<8xf32>
    %22 = vector.multi_reduction <add>, %21, %cst_9 [1] : vector<8x32xf32> to vector<8xf32>
    %23 = vector.shape_cast %22 : vector<8xf32> to vector<8x1xf32>
    %24 = vector.extract_strided_slice %17 {offsets = [0, 64], sizes = [8, 32], strides = [1, 1]} : vector<8x128xf32> to vector<8x32xf32>
    %cst_10 = arith.constant dense<0.000000e+00> : vector<8xf32>
    %25 = vector.multi_reduction <add>, %24, %cst_10 [1] : vector<8x32xf32> to vector<8xf32>
    %26 = vector.shape_cast %25 : vector<8xf32> to vector<8x1xf32>
    %27 = vector.extract_strided_slice %17 {offsets = [0, 96], sizes = [8, 32], strides = [1, 1]} : vector<8x128xf32> to vector<8x32xf32>
    %cst_11 = arith.constant dense<0.000000e+00> : vector<8xf32>
    %28 = vector.multi_reduction <add>, %27, %cst_11 [1] : vector<8x32xf32> to vector<8xf32>
    %29 = vector.shape_cast %28 : vector<8xf32> to vector<8x1xf32>
    %30 = tpu.concatenate %20, %23, %26, %29 in 1 : vector<8x1xf32>, vector<8x1xf32>, vector<8x1xf32>, vector<8x1xf32> -> vector<8x4xf32>
    %31 = arith.mulf %1, %1 : vector<8x128xf32>
    %32 = vector.extract_strided_slice %31 {offsets = [0, 0], sizes = [8, 32], strides = [1, 1]} : vector<8x128xf32> to vector<8x32xf32>
    %cst_12 = arith.constant dense<0.000000e+00> : vector<8xf32>
    %33 = vector.multi_reduction <add>, %32, %cst_12 [1] : vector<8x32xf32> to vector<8xf32>
    %34 = vector.shape_cast %33 : vector<8xf32> to vector<8x1xf32>
    %35 = vector.extract_strided_slice %31 {offsets = [0, 32], sizes = [8, 32], strides = [1, 1]} : vector<8x128xf32> to vector<8x32xf32>
    %cst_13 = arith.constant dense<0.000000e+00> : vector<8xf32>
    %36 = vector.multi_reduction <add>, %35, %cst_13 [1] : vector<8x32xf32> to vector<8xf32>
    %37 = vector.shape_cast %36 : vector<8xf32> to vector<8x1xf32>
    %38 = vector.extract_strided_slice %31 {offsets = [0, 64], sizes = [8, 32], strides = [1, 1]} : vector<8x128xf32> to vector<8x32xf32>
    %cst_14 = arith.constant dense<0.000000e+00> : vector<8xf32>
    %39 = vector.multi_reduction <add>, %38, %cst_14 [1] : vector<8x32xf32> to vector<8xf32>
    %40 = vector.shape_cast %39 : vector<8xf32> to vector<8x1xf32>
    %41 = vector.extract_strided_slice %31 {offsets = [0, 96], sizes = [8, 32], strides = [1, 1]} : vector<8x128xf32> to vector<8x32xf32>
    %cst_15 = arith.constant dense<0.000000e+00> : vector<8xf32>
    %42 = vector.multi_reduction <add>, %41, %cst_15 [1] : vector<8x32xf32> to vector<8xf32>
    %43 = vector.shape_cast %42 : vector<8xf32> to vector<8x1xf32>
    %44 = tpu.concatenate %34, %37, %40, %43 in 1 : vector<8x1xf32>, vector<8x1xf32>, vector<8x1xf32>, vector<8x1xf32> -> vector<8x4xf32>
    %45 = arith.mulf %30, %44 : vector<8x4xf32>
    %cst_16 = arith.constant 9.99999993E-9 : f32
    %cst_17 = arith.constant 9.99999993E-9 : f32
    %46 = arith.mulf %cst_16, %cst_17 : f32
    %47 = vector.broadcast %46 : f32 to vector<8x4xf32>
    %48 = arith.maximumf %45, %47 : vector<8x4xf32>
    %49 = math.rsqrt %48 : vector<8x4xf32>
    %50 = arith.mulf %16, %49 : vector<8x4xf32>
    %51 = arith.subf %50, %2 : vector<8x4xf32>
    %52 = arith.mulf %51, %51 : vector<8x4xf32>
    %c0_18 = arith.constant 0 : index
    %c0_19 = arith.constant 0 : index
    %53 = vector.load %arg4[%c0_18, %c0_19] : memref<8x4xf32, #tpu.memory_space<vmem>>, vector<8x4xf32>
    tpu.vector_store %arg4[%c0_18, %c0_19], %52 {strides = array<i32>} : memref<8x4xf32, #tpu.memory_space<vmem>>, vector<8x4xf32>,
    return
  }
  func.func @transform_0(%arg0: i32) -> (i32, i32) {
    %c0_i32 = arith.constant 0 : i32
    %c0_i32_0 = arith.constant 0 : i32
    return %arg0, %c0_i32 : i32, i32
  }
  func.func @transform_1(%arg0: i32) -> (i32, i32) {
    %c0_i32 = arith.constant 0 : i32
    %c0_i32_0 = arith.constant 0 : i32
    return %arg0, %c0_i32 : i32, i32
  }
  func.func @transform_2(%arg0: i32) -> (i32, i32) {
    %c0_i32 = arith.constant 0 : i32
    %c0_i32_0 = arith.constant 0 : i32
    return %arg0, %c0_i32 : i32, i32
  }
  func.func @transform_3(%arg0: i32) -> (i32, i32) {
    %c0_i32 = arith.constant 0 : i32
    %c0_i32_0 = arith.constant 0 : i32
    return %arg0, %c0_i32 : i32, i32
  }
}

</mosaic_0001>

<bundles_post_ra>
// kernel: tpu_custom_call.1
= control target key start
LH: loop header
LB: loop body
LE: loop exit
PB: predicated region body
PF: predicated region fallthrough
CT: control target
= control target key end

     0   :  { %8 = vsyncpa [#allocation3], 0  ;;  %s154_s12 = smov [#allocation2]   ;;  %s211_s0 = inlined_call_operand.vmem [shape: f32[8,128], index: 0, kind: input, shape index: {}]   ;;  %s212_s1 = inlined_call_operand.hbm [shape: f32[8,128], index: 1, kind: input, shape index: {}]   ;;  %s213_s2 = inlined_call_operand.vmem [shape: f32[8,4], index: 2, kind: input, shape index: {}]   ;;  %s214_s3 = inlined_call_operand.vmem [shape: f32[8,4], index: 3, kind: output, shape index: {}]  }
   0x1   :  { %s17_s13 = sshll.u32 %s154_s12, 4  ;;  %s130_s16 = scalar_lea.hbm %s212_s1, 128  ;;  %s18_s13 = int_to_ptr.vmem [resolvable:$true] %s17_s13 }
   0x2   :  { %p131_p0 = scmp.ne.s32.totalorder %s212_s1, %s130_s16  ;;  %p134_p1 = scmp.lt.u32.totalorder %s130_s16, %s212_s1 }
   0x4   :  { %p136_p2 = pnand %p134_p1, %p131_p0 }
   0x6   :  { %139 = shalt.err (!%p136_p2)
}
   0x7   :  { %s140_s21 = scalar_lea.vmem %s18_s13, 128  ;;  %p145_p4 = scmp.lt.s32.totalorder %s18_s13, %s18_s13 }
   0x8   :  { %p141_p3 = scmp.ne.s32.totalorder %s18_s13, %s140_s21  ;;  %p146_p5 = scmp.lt.s32.totalorder %s140_s21, %s140_s21 }
   0xa   :  { %p147_p6 = por %p146_p5, %p145_p4 }
   0xc   :  { %p148_p7 = pnand %p147_p6, %p141_p3 }
   0xe   :  { %151 = shalt.err (!%p148_p7)
}
   0xf   :  { %20 = dma.hbm_to_vmem [thread:$0]  %s212_s1, 128, %s18_s13, [#allocation3]  }
  0x10   :  { %152 = dma.done.wait [#allocation3], 128  }
  0x11   :  { %153 = vsyncadd [#allocation3], 4294967168  ;;  %v26_v0 = vld [vmem:[%s211_s0] sm:$0xff]  ;;  %vm30_vm0 = vcmask 261120   ;;  %s155_s26 = smov 64   ;;  %s156_s27 = smov 96  }
  0x12   :  { %v27_v1 = vld [vmem:[#allocation2] sm:$0xff]  ;;  %s157_s28 = smov 32   ;;  %v59_v4 = vmul.f32 %v26_v0, %v26_v0  ;;  %vm53_vm1 = vcmask 7168   ;;  %vm55_vm2 = vcmask 15360   ;;  %vm57_vm3 = vcmask 23552  }
  0x13   :  { %v29_v2 = vmul.f32 %v27_v1, %v26_v0  ;;  %v85_v6 = vmul.f32 %v27_v1, %v27_v1  ;;  %v28_v50 = vld [vmem:[%s213_s2] sm:$0xff]  ;;  %vm117_vm4 = vcmask 31744  }
  0x14   :  { %v60_v5 = vsel %vm30_vm0, %v59_v4, 0.0 }
  0x15   :  { %41 = vrot.lane.b32.xlu1 %v29_v2, %s155_s26  ;;  %v31_v3 = vsel %vm30_vm0, %v29_v2, 0.0  ;;  %v86_v7 = vsel %vm30_vm0, %v85_v6, 0.0 }
  0x16   :  { %32 = vadd.xlane.f32.xlu0 %v31_v3 }
  0x2c   :  { %35 = vrot.lane.b32.xlu0 %v29_v2, %s156_s27 }
  0x30   :  { %47 = vrot.lane.b32.xlu0 %v29_v2, %s157_s28 }
  0x34   :  { %64 = vrot.lane.b32.xlu0 %v59_v4, %s156_s27 }
  0x38   :  { %76 = vrot.lane.b32.xlu0 %v59_v4, %s157_s28 }
  0x39   :  { %61 = vadd.xlane.f32.xlu1 %v60_v5 }
  0x4a   :  { %90 = vrot.lane.b32.xlu1 %v85_v6, %s156_s27 }
  0x4e   :  { %70 = vrot.lane.b32.xlu1 %v59_v4, %s155_s26 }
  0x52   :  { %96 = vrot.lane.b32.xlu1 %v85_v6, %s155_s26 }
  0x56   :  { %102 = vrot.lane.b32.xlu1 %v85_v6, %s157_s28 }
  0x57   :  { %87 = vadd.xlane.f32.xlu0 %v86_v7 }
  0x87   :  { %v42_v11 = vpop.permute.xlu1 %41 }
  0x88   :  { %v44_v13 = vsel %vm30_vm0, %v42_v11, 0.0 }
  0xa3   :  { %v33_v8 = vpop.xlane.xlu0 %32 }
  0xa7   :  { %v36_v9 = vpop.permute.xlu0 %35 }
  0xa8   :  { %v38_v10 = vsel %vm30_vm0, %v36_v9, 0.0 }
  0xa9   :  { %39 = vadd.xlane.f32.xlu1 %v38_v10 }
  0xab   :  { %v48_v12 = vpop.permute.xlu0 %47 }
  0xac   :  { %v50_v14 = vsel %vm30_vm0, %v48_v12, 0.0 }
  0xad   :  { %45 = vadd.xlane.f32.xlu1 %v44_v13  ;;  %51 = vadd.xlane.f32.xlu0 %v50_v14 }
  0xaf   :  { %v65_v15 = vpop.permute.xlu0 %64 }
  0xb0   :  { %v67_v16 = vsel %vm30_vm0, %v65_v15, 0.0 }
  0xb1   :  { %68 = vadd.xlane.f32.xlu0 %v67_v16 }
  0xb3   :  { %v77_v17 = vpop.permute.xlu0 %76 }
  0xb4   :  { %v79_v18 = vsel %vm30_vm0, %v77_v17, 0.0 }
  0xb5   :  { %80 = vadd.xlane.f32.xlu0 %v79_v18 }
  0xc6   :  { %v62_v19 = vpop.xlane.xlu1 %61 }
  0xca   :  { %v91_v20 = vpop.permute.xlu1 %90 }
  0xcb   :  { %v93_v21 = vsel %vm30_vm0, %v91_v20, 0.0 }
  0xcc   :  { %94 = vadd.xlane.f32.xlu0 %v93_v21 }
  0xce   :  { %v71_v22 = vpop.permute.xlu1 %70 }
  0xcf   :  { %v73_v23 = vsel %vm30_vm0, %v71_v22, 0.0 }
  0xd0   :  { %74 = vadd.xlane.f32.xlu1 %v73_v23 }
  0xd2   :  { %v97_v24 = vpop.permute.xlu1 %96 }
  0xd3   :  { %v99_v25 = vsel %vm30_vm0, %v97_v24, 0.0 }
  0xd4   :  { %100 = vadd.xlane.f32.xlu1 %v99_v25 }
  0xd6   :  { %v103_v26 = vpop.permute.xlu1 %102 }
  0xd7   :  { %v105_v27 = vsel %vm30_vm0, %v103_v26, 0.0 }
  0xd8   :  { %106 = vadd.xlane.f32.xlu0 %v105_v27 }
  0xe4   :  { %v88_v28 = vpop.xlane.xlu0 %87 }
 0x136   :  { %v40_v30 = vpop.xlane.xlu1 %39 }
 0x137   :  { %v54_v46 = vsel %vm53_vm1, %v33_v8, %v40_v30 }
 0x13a   :  { %v52_v29 = vpop.xlane.xlu0 %51  ;;  %v46_v32 = vpop.xlane.xlu1 %45 }
 0x13b   :  { %v56_v47 = vsel %vm55_vm2, %v54_v46, %v46_v32 }
 0x13c   :  { %v58_v49 = vsel %vm57_vm3, %v56_v47, %v52_v29 }
 0x13e   :  { %v69_v31 = vpop.xlane.xlu0 %68 }
 0x13f   :  { %v82_v36 = vsel %vm53_vm1, %v62_v19, %v69_v31 }
 0x142   :  { %v81_v33 = vpop.xlane.xlu0 %80 }
 0x159   :  { %v95_v35 = vpop.xlane.xlu0 %94 }
 0x15a   :  { %v108_v39 = vsel %vm53_vm1, %v88_v28, %v95_v35 }
 0x15d   :  { %v75_v34 = vpop.xlane.xlu1 %74 }
 0x15e   :  { %v83_v38 = vsel %vm55_vm2, %v82_v36, %v75_v34 }
 0x15f   :  { %v84_v42 = vsel %vm57_vm3, %v83_v38, %v81_v33 }
 0x161   :  { %v101_v37 = vpop.xlane.xlu1 %100 }
 0x162   :  { %v109_v40 = vsel %vm55_vm2, %v108_v39, %v101_v37 }
 0x165   :  { %v107_v41 = vpop.xlane.xlu0 %106 }
 0x166   :  { %v110_v43 = vsel %vm57_vm3, %v109_v40, %v107_v41 }
 0x167   :  { %v111_v44 = vmul.f32 %v110_v43, %v84_v42 }
 0x169   :  { %v112_v45 = vmax.f32 %v111_v44, 1e-16 }
 0x16b   :  { %128 = vrsqrt.f32 %v112_v45 }
 0x175   :  { %v129_v48 = vpop.eup %128 }
 0x176   :  { %v114_v51 = vmul.f32 %v129_v48, %v58_v49 }
 0x178   :  { %v115_v52 = vsub.f32 %v114_v51, %v28_v50 }
 0x17a   :  { %v116_v53 = vmul.f32 %v115_v52, %v115_v52 }
 0x17c   :  { %118 = vst.msk [vmem:[%s214_s3] sm:$0xff] %vm117_vm4, %v116_v53 }
 0x17d   :  { %123 = vsyncpa [#allocation3], 1 }

</bundles_post_ra>
